<compile_context>
chip_gen: v5e
topology: v5e:2x2
jax: 0.10.0
libtpu: 0.0.40
codegen_flags: <defaults>
</compile_context>

<pallas_src>
import jax
import jax.numpy as jnp
from jax.experimental import pallas as pl
from jax.experimental.pallas import tpu as pltpu


def _round_up(a, b):
    return (a + b - 1) // b * b


# ---------------------------------------------------------------------------
# Kernels
# ---------------------------------------------------------------------------

def _layer1_vpu(x_ref, w1_ref, b1_ref):
    """linear1 + tanh with K=2 done on the VPU (two broadcast FMAs, no MXU)."""
    x = x_ref[...]                       # (TN, 2) f32
    w1 = w1_ref[...]                     # (2, Hp) f32
    i = x[:, 0:1] * w1[0:1, :] + x[:, 1:2] * w1[1:2, :] + b1_ref[...]
    return jnp.tanh(i)                   # (TN, Hp) f32


def full4net_kernel(x_ref, w1_ref, b1_ref, w2_ref, b2_ref, w3_ref, b3_ref,
                    wo_ref, bo_ref, h1_ref, h2_ref, h3_ref, out_ref):
    h1 = _layer1_vpu(x_ref, w1_ref, b1_ref)
    h1_ref[...] = h1

    wdt = w2_ref.dtype                   # f32 or bf16 weights; f32 accumulate
    h2 = jnp.tanh(jnp.dot(h1.astype(wdt), w2_ref[...],
                          preferred_element_type=jnp.float32) + b2_ref[...])
    h2_ref[...] = h2

    # linear3 + tanh (stored as self.hid3 in the torch module, unused by output)
    h3_ref[...] = jnp.tanh(jnp.dot(h2.astype(wdt), w3_ref[...],
                                   preferred_element_type=jnp.float32) + b3_ref[...])

    # output layer applied to hid2 (matches the reference module exactly);
    # lane-dense (TN, 128) slab, real output lives in column 0.
    l = jnp.dot(h2.astype(wdt), wo_ref[...],
                preferred_element_type=jnp.float32) + bo_ref[0, 0]
    out_ref[...] = jax.nn.sigmoid(l)


def full4net_kernel_no_h3(x_ref, w1_ref, b1_ref, w2_ref, b2_ref,
                          wo_ref, bo_ref, h1_ref, h2_ref, out_ref):
    """Inference-only variant: skips the unused hid3 layer (output uses hid2)."""
    h1 = _layer1_vpu(x_ref, w1_ref, b1_ref)
    h1_ref[...] = h1

    wdt = w2_ref.dtype
    h2 = jnp.tanh(jnp.dot(h1.astype(wdt), w2_ref[...],
                          preferred_element_type=jnp.float32) + b2_ref[...])
    h2_ref[...] = h2

    l = jnp.dot(h2.astype(wdt), wo_ref[...],
                preferred_element_type=jnp.float32) + bo_ref[0, 0]
    out_ref[...] = jax.nn.sigmoid(l)


# ---------------------------------------------------------------------------
# Wrapper
# ---------------------------------------------------------------------------

_OUT_PAD = 128  # lane-dense width of the packed output slab


def prepare_params(params, weight_dtype=jnp.float32):
    """One-time weight prep: transpose to (in, out), pad hid to 128 lanes,
    optionally cast the hid x hid / output weights to bf16 (f32 accumulate).
    Layer-1 weights and all biases stay f32 (layer 1 runs on the VPU; keeps
    tanh/sigmoid operands f32, which matters on v5e)."""
    hid = params["w1"].shape[0]
    hp = _round_up(hid, 128)

    def pad2(a, rows, cols):
        return jnp.pad(a, ((0, rows - a.shape[0]), (0, cols - a.shape[1])))

    return dict(
        hid=hid, hid_pad=hp,
        w1t=pad2(params["w1"].T, 2, hp).astype(jnp.float32),          # (2, Hp)
        b1=pad2(params["b1"].reshape(1, -1), 1, hp).astype(jnp.float32),
        w2t=pad2(params["w2"].T, hp, hp).astype(weight_dtype),        # (Hp, Hp)
        b2=pad2(params["b2"].reshape(1, -1), 1, hp).astype(jnp.float32),
        w3t=pad2(params["w3"].T, hp, hp).astype(weight_dtype),        # (Hp, Hp)
        b3=pad2(params["b3"].reshape(1, -1), 1, hp).astype(jnp.float32),
        wot=pad2(params["wo"].T, hp, _OUT_PAD).astype(weight_dtype),  # (Hp, 128)
        bo=params["bo"].reshape(1, 1).astype(jnp.float32),            # SMEM scalar
    )


def full4net_forward(x, prep, *, with_hid3=True, tile_n=None):
    """x: (N, 2) float32. prep: output of prepare_params.
    Returns (out (N,1), (hid1, hid2, hid3)); hid3 is None if with_hid3=False."""
    n = x.shape[0]
    hid, hp = prep["hid"], prep["hid_pad"]

    if tile_n is None:
        tile_n = min(512, _round_up(max(n, 8), 8))
    tile_n = _round_up(tile_n, 8)
    n_pad = _round_up(n, tile_n)
    xp = x if n_pad == n else jnp.pad(x, ((0, n_pad - n), (0, 0)))
    grid = (n_pad // tile_n,)

    def row_spec(width):           # row-tiled activations / outputs
        return pl.BlockSpec((tile_n, width), lambda i: (i, 0))

    def res_spec(shape):           # VMEM-resident weights/biases (constant index)
        return pl.BlockSpec(shape, lambda i: (0, 0))

    smem_spec = pl.BlockSpec(memory_space=pltpu.MemorySpace.SMEM)

    in_specs = [row_spec(2),
                res_spec((2, hp)), res_spec((1, hp)),
                res_spec((hp, hp)), res_spec((1, hp))]
    args = [xp, prep["w1t"], prep["b1"], prep["w2t"], prep["b2"]]
    out_specs = [row_spec(hp), row_spec(hp)]
    out_shapes = [jax.ShapeDtypeStruct((n_pad, hp), jnp.float32),
                  jax.ShapeDtypeStruct((n_pad, hp), jnp.float32)]

    if with_hid3:
        kernel = full4net_kernel
        in_specs += [res_spec((hp, hp)), res_spec((1, hp))]
        args += [prep["w3t"], prep["b3"]]
        out_specs.append(row_spec(hp))
        out_shapes.append(jax.ShapeDtypeStruct((n_pad, hp), jnp.float32))
    else:
        kernel = full4net_kernel_no_h3

    in_specs += [res_spec((hp, _OUT_PAD)), smem_spec]
    args += [prep["wot"], prep["bo"]]
    out_specs.append(row_spec(_OUT_PAD))
    out_shapes.append(jax.ShapeDtypeStruct((n_pad, _OUT_PAD), jnp.float32))

    results = pl.pallas_call(
        kernel,
        grid=grid,
        in_specs=in_specs,
        out_specs=tuple(out_specs),
        out_shape=tuple(out_shapes),
        compiler_params=pltpu.CompilerParams(
            dimension_semantics=("parallel",),        # shard rows across TCs (v7x)
            vmem_limit_bytes=32 * 1024 * 1024),       # explicit, safe on 64 MiB v7x
    )(*args)

    if with_hid3:
        h1p, h2p, h3p, outp = results
        h3 = h3p[:n, :hid]
    else:
        h1p, h2p, outp = results
        h3 = None
    return outp[:n, :1], (h1p[:n, :hid], h2p[:n, :hid], h3)


# ---------------------------------------------------------------------------
# Init / reference
# ---------------------------------------------------------------------------

def init_params(key, hid):
    """Deterministic init mimicking nn.Linear's uniform(-1/sqrt(fan_in), ...)."""
    ks = jax.random.split(key, 8)

    def lin(kw, kb, fan_in, fan_out):
        bound = 1.0 / jnp.sqrt(fan_in)
        w = jax.random.uniform(kw, (fan_out, fan_in), jnp.float32, -bound, bound)
        b = jax.random.uniform(kb, (fan_out,), jnp.float32, -bound, bound)
        return w, b

    w1, b1 = lin(ks[0], ks[1], 2, hid)
    w2, b2 = lin(ks[2], ks[3], hid, hid)
    w3, b3 = lin(ks[4], ks[5], hid, hid)
    wo, bo = lin(ks[6], ks[7], hid, 1)
    return dict(w1=w1, b1=b1, w2=w2, b2=b2, w3=w3, b3=b3, wo=wo, bo=bo)


def reference_forward(x, p):
    """Pure-JAX reference matching the torch module."""
    h1 = jnp.tanh(x @ p["w1"].T + p["b1"])
    h2 = jnp.tanh(h1 @ p["w2"].T + p["b2"])
    h3 = jnp.tanh(h2 @ p["w3"].T + p["b3"])
    out = jax.nn.sigmoid(h2 @ p["wo"].T + p["bo"])
    return out, (h1, h2, h3)


if __name__ == "__main__":
    key = jax.random.PRNGKey(0)
    k_param, k_x, k_x2 = jax.random.split(key, 3)

    N, hid = 8, 32
    params = init_params(k_param, hid)
    x = jax.random.normal(k_x, (N, 2), jnp.float32)
    ref_out, (r1, r2, r3) = reference_forward(x, params)

    # --- f32 weights, full module parity (hid3 computed) ---
    prep32 = prepare_params(params, weight_dtype=jnp.float32)
    out, (h1, h2, h3) = full4net_forward(x, prep32, with_hid3=True)
    out = jax.block_until_ready(out)
    assert out.shape == (N, 1)
    assert jnp.allclose(out, ref_out, atol=1e-5), "output mismatch"
    assert jnp.allclose(h1, r1, atol=1e-5), "hid1 mismatch"
    assert jnp.allclose(h2, r2, atol=1e-5), "hid2 mismatch"
    assert jnp.allclose(h3, r3, atol=1e-5), "hid3 mismatch"

    # --- inference-only path: unused hid3 layer skipped ---
    out_b, (h1b, h2b, h3b) = full4net_forward(x, prep32, with_hid3=False)
    out_b = jax.block_until_ready(out_b)
    assert h3b is None
    assert jnp.allclose(out_b, ref_out, atol=1e-5), "no-hid3 output mismatch"
    assert jnp.allclose(h2b, r2, atol=1e-5), "no-hid3 hid2 mismatch"

    # --- larger batch exercising the row grid (2 tiles of 512, padded from 1000)
    #     with bf16 hid x hid / output weights (f32 accumulate) ---
    N2 = 1000
    x2 = jax.random.normal(k_x2, (N2, 2), jnp.float32)
    ref2_out, (ref2_h1, _, _) = reference_forward(x2, params)
    prep16 = prepare_params(params, weight_dtype=jnp.bfloat16)
    out2, (h1_2, _, _) = full4net_forward(x2, prep16, with_hid3=True)
    out2 = jax.block_until_ready(out2)
    assert out2.shape == (N2, 1)
    assert jnp.allclose(h1_2, ref2_h1, atol=1e-5), "tiled hid1 mismatch"
    assert jnp.allclose(out2, ref2_out, atol=3e-2), "tiled bf16 output mismatch"

    print("KERNEL_OK")
</pallas_src>

<mosaic_0001>
module attributes {stable_mosaic.version = 11 : i64} {
  func.func @full4net_kernel(%arg0: i32, %arg1: memref<8x2xf32, #tpu.memory_space<vmem>>, %arg2: memref<2x128xf32, #tpu.memory_space<vmem>>, %arg3: memref<1x128xf32, #tpu.memory_space<vmem>>, %arg4: memref<128x128xf32, #tpu.memory_space<vmem>>, %arg5: memref<1x128xf32, #tpu.memory_space<vmem>>, %arg6: memref<128x128xf32, #tpu.memory_space<vmem>>, %arg7: memref<1x128xf32, #tpu.memory_space<vmem>>, %arg8: memref<128x128xf32, #tpu.memory_space<vmem>>, %arg9: memref<1x1xf32, #tpu.memory_space<smem>>, %arg10: memref<8x128xf32, #tpu.memory_space<vmem>>, %arg11: memref<8x128xf32, #tpu.memory_space<vmem>>, %arg12: memref<8x128xf32, #tpu.memory_space<vmem>>, %arg13: memref<8x128xf32, #tpu.memory_space<vmem>>) attributes {dimension_semantics = [#tpu.dimension_semantics<parallel>], iteration_bounds = array<i64: 1>, scalar_prefetch = 0 : i64, scratch_operands = 0 : i64, tpu.core_type = #tpu.core_type<tc>, window_params = [{transform_indices = @transform_0, window_bounds = array<i64: 8, 2>}, {pipeline_mode = #tpu.pipeline_mode<synchronous>, transform_indices = @transform_1, window_bounds = array<i64: 2, 128>}, {pipeline_mode = #tpu.pipeline_mode<synchronous>, transform_indices = @transform_2, window_bounds = array<i64: 1, 128>}, {pipeline_mode = #tpu.pipeline_mode<synchronous>, transform_indices = @transform_3, window_bounds = array<i64: 128, 128>}, {pipeline_mode = #tpu.pipeline_mode<synchronous>, transform_indices = @transform_4, window_bounds = array<i64: 1, 128>}, {pipeline_mode = #tpu.pipeline_mode<synchronous>, transform_indices = @transform_5, window_bounds = array<i64: 128, 128>}, {pipeline_mode = #tpu.pipeline_mode<synchronous>, transform_indices = @transform_6, window_bounds = array<i64: 1, 128>}, {pipeline_mode = #tpu.pipeline_mode<synchronous>, transform_indices = @transform_7, window_bounds = array<i64: 128, 128>}, {transform_indices = @transform_8, window_bounds = array<i64: 1, 1>}, {transform_indices = @transform_9, window_bounds = array<i64: 8, 128>}, {transform_indices = @transform_10, window_bounds = array<i64: 8, 128>}, {transform_indices = @transform_11, window_bounds = array<i64: 8, 128>}, {transform_indices = @transform_12, window_bounds = array<i64: 8, 128>}]} {
    %c0 = arith.constant 0 : index
    %c0_0 = arith.constant 0 : index
    %0 = vector.load %arg1[%c0, %c0_0] : memref<8x2xf32, #tpu.memory_space<vmem>>, vector<8x2xf32>
    %c0_1 = arith.constant 0 : index
    %c0_2 = arith.constant 0 : index
    %1 = vector.load %arg2[%c0_1, %c0_2] : memref<2x128xf32, #tpu.memory_space<vmem>>, vector<2x128xf32>
    %2 = vector.extract_strided_slice %0 {offsets = [0, 0], sizes = [8, 1], strides = [1, 1]} : vector<8x2xf32> to vector<8x1xf32>
    %3 = vector.extract_strided_slice %1 {offsets = [0, 0], sizes = [1, 128], strides = [1, 1]} : vector<2x128xf32> to vector<1x128xf32>
    %4 = vector.broadcast %2 : vector<8x1xf32> to vector<8x128xf32>
    %5 = vector.broadcast %3 : vector<1x128xf32> to vector<8x128xf32>
    %6 = arith.mulf %4, %5 : vector<8x128xf32>
    %7 = vector.extract_strided_slice %0 {offsets = [0, 1], sizes = [8, 1], strides = [1, 1]} : vector<8x2xf32> to vector<8x1xf32>
    %8 = vector.extract_strided_slice %1 {offsets = [1, 0], sizes = [1, 128], strides = [1, 1]} : vector<2x128xf32> to vector<1x128xf32>
    %9 = vector.broadcast %7 : vector<8x1xf32> to vector<8x128xf32>
    %10 = vector.broadcast %8 : vector<1x128xf32> to vector<8x128xf32>
    %11 = arith.mulf %9, %10 : vector<8x128xf32>
    %12 = arith.addf %6, %11 : vector<8x128xf32>
    %c0_3 = arith.constant 0 : index
    %c0_4 = arith.constant 0 : index
    %13 = vector.load %arg3[%c0_3, %c0_4] : memref<1x128xf32, #tpu.memory_space<vmem>>, vector<1x128xf32>
    %14 = vector.broadcast %13 : vector<1x128xf32> to vector<8x128xf32>
    %15 = arith.addf %12, %14 : vector<8x128xf32>
    %16 = math.tanh %15 : vector<8x128xf32>
    %c0_5 = arith.constant 0 : index
    %c0_6 = arith.constant 0 : index
    %17 = vector.load %arg10[%c0_5, %c0_6] : memref<8x128xf32, #tpu.memory_space<vmem>>, vector<8x128xf32>
    tpu.vector_store %arg10[%c0_5, %c0_6], %16 {strides = array<i32>} : memref<8x128xf32, #tpu.memory_space<vmem>>, vector<8x128xf32>,
    %c0_7 = arith.constant 0 : index
    %c0_8 = arith.constant 0 : index
    %18 = vector.load %arg4[%c0_7, %c0_8] : memref<128x128xf32, #tpu.memory_space<vmem>>, vector<128x128xf32>
    %cst = arith.constant dense<0.000000e+00> : vector<8x128xf32>
    %19 = tpu.matmul %16, %18, %cst {dimension_numbers = #tpu.dot_dimension_numbers<[1], [0], [0], [1], [0, 0, 1, 1], [], []>} : vector<8x128xf32>, vector<128x128xf32>, vector<8x128xf32> -> vector<8x128xf32>
    %c0_9 = arith.constant 0 : index
    %c0_10 = arith.constant 0 : index
    %20 = vector.load %arg5[%c0_9, %c0_10] : memref<1x128xf32, #tpu.memory_space<vmem>>, vector<1x128xf32>
    %21 = vector.broadcast %20 : vector<1x128xf32> to vector<8x128xf32>
    %22 = arith.addf %19, %21 : vector<8x128xf32>
    %23 = math.tanh %22 : vector<8x128xf32>
    %c0_11 = arith.constant 0 : index
    %c0_12 = arith.constant 0 : index
    %24 = vector.load %arg11[%c0_11, %c0_12] : memref<8x128xf32, #tpu.memory_space<vmem>>, vector<8x128xf32>
    tpu.vector_store %arg11[%c0_11, %c0_12], %23 {strides = array<i32>} : memref<8x128xf32, #tpu.memory_space<vmem>>, vector<8x128xf32>,
    %c0_13 = arith.constant 0 : index
    %c0_14 = arith.constant 0 : index
    %25 = vector.load %arg6[%c0_13, %c0_14] : memref<128x128xf32, #tpu.memory_space<vmem>>, vector<128x128xf32>
    %cst_15 = arith.constant dense<0.000000e+00> : vector<8x128xf32>
    %26 = tpu.matmul %23, %25, %cst_15 {dimension_numbers = #tpu.dot_dimension_numbers<[1], [0], [0], [1], [0, 0, 1, 1], [], []>} : vector<8x128xf32>, vector<128x128xf32>, vector<8x128xf32> -> vector<8x128xf32>
    %c0_16 = arith.constant 0 : index
    %c0_17 = arith.constant 0 : index
    %27 = vector.load %arg7[%c0_16, %c0_17] : memref<1x128xf32, #tpu.memory_space<vmem>>, vector<1x128xf32>
    %28 = vector.broadcast %27 : vector<1x128xf32> to vector<8x128xf32>
    %29 = arith.addf %26, %28 : vector<8x128xf32>
    %30 = math.tanh %29 : vector<8x128xf32>
    %c0_18 = arith.constant 0 : index
    %c0_19 = arith.constant 0 : index
    %31 = vector.load %arg12[%c0_18, %c0_19] : memref<8x128xf32, #tpu.memory_space<vmem>>, vector<8x128xf32>
    tpu.vector_store %arg12[%c0_18, %c0_19], %30 {strides = array<i32>} : memref<8x128xf32, #tpu.memory_space<vmem>>, vector<8x128xf32>,
    %c0_20 = arith.constant 0 : index
    %c0_21 = arith.constant 0 : index
    %32 = vector.load %arg8[%c0_20, %c0_21] : memref<128x128xf32, #tpu.memory_space<vmem>>, vector<128x128xf32>
    %cst_22 = arith.constant dense<0.000000e+00> : vector<8x128xf32>
    %33 = tpu.matmul %23, %32, %cst_22 {dimension_numbers = #tpu.dot_dimension_numbers<[1], [0], [0], [1], [0, 0, 1, 1], [], []>} : vector<8x128xf32>, vector<128x128xf32>, vector<8x128xf32> -> vector<8x128xf32>
    %c0_23 = arith.constant 0 : index
    %c0_24 = arith.constant 0 : index
    %34 = memref.load %arg9[%c0_23, %c0_24] : memref<1x1xf32, #tpu.memory_space<smem>>
    %35 = vector.broadcast %34 : f32 to vector<8x128xf32>
    %36 = arith.addf %33, %35 : vector<8x128xf32>
    %37 = arith.negf %36 : vector<8x128xf32>
    %38 = math.exp %37 : vector<8x128xf32>
    %cst_25 = arith.constant 1.000000e+00 : f32
    %39 = vector.broadcast %cst_25 : f32 to vector<8x128xf32>
    %40 = arith.addf %39, %38 : vector<8x128xf32>
    %41 = arith.divf %39, %40 : vector<8x128xf32>
    %c0_26 = arith.constant 0 : index
    %c0_27 = arith.constant 0 : index
    %42 = vector.load %arg13[%c0_26, %c0_27] : memref<8x128xf32, #tpu.memory_space<vmem>>, vector<8x128xf32>
    tpu.vector_store %arg13[%c0_26, %c0_27], %41 {strides = array<i32>} : memref<8x128xf32, #tpu.memory_space<vmem>>, vector<8x128xf32>,
    return
  }
  func.func @transform_0(%arg0: i32) -> (i32, i32) {
    %c0_i32 = arith.constant 0 : i32
    %c0_i32_0 = arith.constant 0 : i32
    return %arg0, %c0_i32 : i32, i32
  }
  func.func @transform_1(%arg0: i32) -> (i32, i32) {
    %c0_i32 = arith.constant 0 : i32
    %c0_i32_0 = arith.constant 0 : i32
    %c0_i32_1 = arith.constant 0 : i32
    return %c0_i32, %c0_i32_0 : i32, i32
  }
  func.func @transform_2(%arg0: i32) -> (i32, i32) {
    %c0_i32 = arith.constant 0 : i32
    %c0_i32_0 = arith.constant 0 : i32
    %c0_i32_1 = arith.constant 0 : i32
    return %c0_i32, %c0_i32_0 : i32, i32
  }
  func.func @transform_3(%arg0: i32) -> (i32, i32) {
    %c0_i32 = arith.constant 0 : i32
    %c0_i32_0 = arith.constant 0 : i32
    %c0_i32_1 = arith.constant 0 : i32
    return %c0_i32, %c0_i32_0 : i32, i32
  }
  func.func @transform_4(%arg0: i32) -> (i32, i32) {
    %c0_i32 = arith.constant 0 : i32
    %c0_i32_0 = arith.constant 0 : i32
    %c0_i32_1 = arith.constant 0 : i32
    return %c0_i32, %c0_i32_0 : i32, i32
  }
  func.func @transform_5(%arg0: i32) -> (i32, i32) {
    %c0_i32 = arith.constant 0 : i32
    %c0_i32_0 = arith.constant 0 : i32
    %c0_i32_1 = arith.constant 0 : i32
    return %c0_i32, %c0_i32_0 : i32, i32
  }
  func.func @transform_6(%arg0: i32) -> (i32, i32) {
    %c0_i32 = arith.constant 0 : i32
    %c0_i32_0 = arith.constant 0 : i32
    %c0_i32_1 = arith.constant 0 : i32
    return %c0_i32, %c0_i32_0 : i32, i32
  }
  func.func @transform_7(%arg0: i32) -> (i32, i32) {
    %c0_i32 = arith.constant 0 : i32
    %c0_i32_0 = arith.constant 0 : i32
    %c0_i32_1 = arith.constant 0 : i32
    return %c0_i32, %c0_i32_0 : i32, i32
  }
  func.func @transform_8(%arg0: i32) -> (i32, i32) {
    %c0_i32 = arith.constant 0 : i32
    %c0_i32_0 = arith.constant 0 : i32
    %c0_i32_1 = arith.constant 0 : i32
    return %c0_i32, %c0_i32_0 : i32, i32
  }
  func.func @transform_9(%arg0: i32) -> (i32, i32) {
    %c0_i32 = arith.constant 0 : i32
    %c0_i32_0 = arith.constant 0 : i32
    return %arg0, %c0_i32 : i32, i32
  }
  func.func @transform_10(%arg0: i32) -> (i32, i32) {
    %c0_i32 = arith.constant 0 : i32
    %c0_i32_0 = arith.constant 0 : i32
    return %arg0, %c0_i32 : i32, i32
  }
  func.func @transform_11(%arg0: i32) -> (i32, i32) {
    %c0_i32 = arith.constant 0 : i32
    %c0_i32_0 = arith.constant 0 : i32
    return %arg0, %c0_i32 : i32, i32
  }
  func.func @transform_12(%arg0: i32) -> (i32, i32) {
    %c0_i32 = arith.constant 0 : i32
    %c0_i32_0 = arith.constant 0 : i32
    return %arg0, %c0_i32 : i32, i32
  }
}

</mosaic_0001>

<bundles_post_ra>
// kernel: tpu_custom_call.1
= control target key start
LH: loop header
LB: loop body
LE: loop exit
PB: predicated region body
PF: predicated region fallthrough
CT: control target
= control target key end

     0   :  { %19 = vsyncpa [#allocation4], 0  ;;  %s637_s0 = inlined_call_operand.vmem [shape: f32[8,2], index: 0, kind: input, shape index: {}]   ;;  %s638_s1 = inlined_call_operand.vmem [shape: f32[2,128], index: 1, kind: input, shape index: {}]   ;;  %s639_s2 = inlined_call_operand.vmem [shape: f32[1,128], index: 2, kind: input, shape index: {}]   ;;  %s640_s3 = inlined_call_operand.hbm [shape: f32[128,128], index: 3, kind: input, shape index: {}]   ;;  %s641_s4 = inlined_call_operand.vmem [shape: f32[1,128], index: 4, kind: input, shape index: {}]   ;;  %s642_s5 = inlined_call_operand.hbm [shape: f32[128,128], index: 5, kind: input, shape index: {}]   ;;  %s643_s6 = inlined_call_operand.vmem [shape: f32[1,128], index: 6, kind: input, shape index: {}]   ;;  %s644_s7 = inlined_call_operand.hbm [shape: f32[128,128], index: 7, kind: input, shape index: {}]   ;;  %s645_s8 = inlined_call_operand.<no memory space> [shape: f32[1,1], index: 8, kind: input, shape index: {}]   ;;  %s646_s9 = inlined_call_operand.hbm [shape: f32[8,128], index: 9, kind: output, shape index: {0}]   ;;  %s647_s10 = inlined_call_operand.hbm [shape: f32[8,128], index: 10, kind: output, shape index: {1}]   ;;  %s648_s11 = inlined_call_operand.hbm [shape: f32[8,128], index: 11, kind: output, shape index: {2}]   ;;  %s649_s12 = inlined_call_operand.hbm [shape: f32[8,128], index: 12, kind: output, shape index: {3}]  }
   0x1   :  { %20 = vsyncpa [#allocation7], 0 }
   0x2   :  { %21 = vsyncpa [#allocation5], 0 }
   0x3   :  { %22 = vsyncpa [#allocation11], 0 }
   0x4   :  { %23 = vsyncpa [#allocation14], 0  ;;  %s49_s23 = sshll.u32 %s642_s5, 4  ;;  %s522_s24 = smov [#allocation6]   ;;  %s50_s23 = int_to_ptr.hbm [resolvable:$true] %s49_s23 }
   0x5   :  { %s51_s25 = sshll.u32 %s522_s24, 4  ;;  %s34_s28 = sshll.u32 %s640_s3, 4  ;;  %s52_s25 = int_to_ptr.vmem [resolvable:$true] %s51_s25  ;;  %s35_s28 = int_to_ptr.hbm [resolvable:$true] %s34_s28 }
   0x6   :  { %s523_s29 = smov 128   ;;  %s524_s30 = smov 8  }
   0x7   :  { %57 = dma.hbm_to_vmem [thread:$0]  %s50_s23, 2048, %s52_s25, [#allocation7], %s523_s29, %s523_s29, %s524_s30  }
   0x8   :  { %s525_s13 = smov [#allocation3]   ;;  %s64_s17 = sshll.u32 %s644_s7, 4  ;;  %s65_s17 = int_to_ptr.hbm [resolvable:$true] %s64_s17 }
   0x9   :  { %s36_s14 = sshll.u32 %s525_s13, 4  ;;  %s526_s5 = smov [#allocation8]   ;;  %s37_s14 = int_to_ptr.vmem [resolvable:$true] %s36_s14 }
   0xa   :  { %42 = dma.hbm_to_vmem [thread:$0]  %s35_s28, 2048, %s37_s14, [#allocation4], %s523_s29, %s523_s29, %s524_s30  }
   0xb   :  { %s66_s18 = sshll.u32 %s526_s5, 4  ;;  %s67_s18 = int_to_ptr.vmem [resolvable:$true] %s66_s18 }
   0xc   :  { %72 = dma.hbm_to_vmem [thread:$0]  %s65_s17, 2048, %s67_s18, [#allocation7], %s523_s29, %s523_s29, %s524_s30  }
   0xd   :  { %512 = dma.done.wait [#allocation4], 2048  }
   0xe   :  { %513 = vsyncadd [#allocation4], 4294965248 }
   0xf   :  { %514 = dma.done.wait [#allocation7], 4096  }
  0x10   :  { %515 = vsyncadd [#allocation7], 4294963200  ;;  %v527_v0 = vmov 0   ;;  %v87_v1 = vld [vmem:[%s637_s0] sm:$0xff]  ;;  %v125_v2 = vld [vmem:[#allocation3 + $0x78] sm:$0xff]  ;;  %v528_v7 = vmov 1  }
  0x11   :  { %329 = vset.pattern.permute.xlu0 %v527_v0  ;;  %v124_v3 = vld [vmem:[#allocation3 + $0x70] sm:$0xff]  ;;  %130 = vmatpush.msra.mxu0 %v125_v2  ;;  %v123_v4 = vld [vmem:[#allocation3 + $0x68] sm:$0xff]  ;;  %v122_v5 = vld [vmem:[#allocation3 + $0x60] sm:$0xff]  ;;  %s270_s24 = sshll.u32 %s647_s10, 4  ;;  %s529_s25 = smov [#allocation10]   ;;  %s271_s24 = int_to_ptr.hbm [resolvable:$true] %s270_s24 }
  0x12   :  { %91 = vperm.xlu0 %329, %v87_v1   ;;  %v121_v6 = vld [vmem:[#allocation3 + $0x58] sm:$0xff]  ;;  %v120_v8 = vld [vmem:[#allocation3 + $0x50] sm:$0xff]  ;;  %v119_v9 = vld [vmem:[#allocation3 + $0x48] sm:$0xff]  ;;  %s268_s26 = sshll.u32 %s529_s25, 4  ;;  %s530_s27 = smov [#allocation9]   ;;  %s269_s26 = int_to_ptr.vmem [resolvable:$true] %s268_s26 }
  0x13   :  { %131 = vmatpush.msra.mxu0 %v124_v3  ;;  %v118_v10 = vld [vmem:[#allocation3 + $0x40] sm:$0xff]  ;;  %v117_v11 = vld [vmem:[#allocation3 + $0x38] sm:$0xff]  ;;  %v116_v12 = vld [vmem:[#allocation3 + $0x30] sm:$0xff]  ;;  %s257_s28 = sshll.u32 %s530_s27, 4  ;;  %s259_s30 = sshll.u32 %s646_s9, 4  ;;  %s258_s28 = int_to_ptr.vmem [resolvable:$true] %s257_s28  ;;  %s260_s30 = int_to_ptr.hbm [resolvable:$true] %s259_s30 }
  0x14   :  { %v115_v13 = vld [vmem:[#allocation3 + $0x28] sm:$0xff]  ;;  %v114_v14 = vld [vmem:[#allocation3 + $0x20] sm:$0xff]  ;;  %v113_v15 = vld [vmem:[#allocation3 + $0x18] sm:$0xff]  ;;  %s531_s16 = smov [#allocation12]   ;;  %s281_s9 = sshll.u32 %s648_s11, 4  ;;  %s282_s9 = int_to_ptr.hbm [resolvable:$true] %s281_s9 }
  0x15   :  { %132 = vmatpush.msra.mxu0 %v123_v4  ;;  %v112_v16 = vld [vmem:[#allocation3 + $0x10] sm:$0xff]  ;;  %v111_v17 = vld [vmem:[#allocation3 + $0x8] sm:$0xff]  ;;  %v110_v18 = vld [vmem:[#allocation3] sm:$0xff]  ;;  %s279_s17 = sshll.u32 %s531_s16, 4  ;;  %s292_s19 = sshll.u32 %s649_s12, 4  ;;  %s280_s17 = int_to_ptr.vmem [resolvable:$true] %s279_s17  ;;  %s293_s19 = int_to_ptr.hbm [resolvable:$true] %s292_s19 }
  0x16   :  { %v167_v19 = vld [vmem:[#allocation6 + $0x78] sm:$0xff]  ;;  %v166_v21 = vld [vmem:[#allocation6 + $0x70] sm:$0xff]  ;;  %v165_v23 = vld [vmem:[#allocation6 + $0x68] sm:$0xff] }
  0x17   :  { %133 = vmatpush.msra.mxu0 %v122_v5  ;;  %v209_v20 = vld [vmem:[#allocation8 + $0x78] sm:$0xff]  ;;  %172 = vmatpush.msra.mxu1 %v167_v19  ;;  %v208_v22 = vld [vmem:[#allocation8 + $0x70] sm:$0xff]  ;;  %v207_v24 = vld [vmem:[#allocation8 + $0x68] sm:$0xff]  ;;  %v211_v5 = vstv %s645_s8 }
  0x18   :  { %212 = vmatpush.msra.mxu2 %v209_v20  ;;  %v164_v25 = vld [vmem:[#allocation6 + $0x60] sm:$0xff]  ;;  %v163_v27 = vld [vmem:[#allocation6 + $0x58] sm:$0xff]  ;;  %v162_v29 = vld [vmem:[#allocation6 + $0x50] sm:$0xff] }
  0x19   :  { %134 = vmatpush.msra.mxu0 %v121_v6  ;;  %173 = vmatpush.msra.mxu1 %v166_v21  ;;  %v206_v26 = vld [vmem:[#allocation8 + $0x60] sm:$0xff]  ;;  %v205_v28 = vld [vmem:[#allocation8 + $0x58] sm:$0xff]  ;;  %v204_v30 = vld [vmem:[#allocation8 + $0x50] sm:$0xff] }
  0x1a   :  { %330 = vset.pattern.permute.xlu0 %v528_v7  ;;  %213 = vmatpush.msra.mxu2 %v208_v22  ;;  %v161_v32 = vld [vmem:[#allocation6 + $0x48] sm:$0xff]  ;;  %v88_v34 = vld [vmem:[%s638_s1] sm:$0x3]  ;;  %v159_v37 = vld [vmem:[#allocation6 + $0x38] sm:$0xff] }
  0x1b   :  { %97 = vperm.xlu0 %330, %v87_v1   ;;  %135 = vmatpush.msra.mxu0 %v120_v8  ;;  %v203_v33 = vld [vmem:[#allocation8 + $0x48] sm:$0xff]  ;;  %v160_v35 = vld [vmem:[#allocation6 + $0x40] sm:$0xff]  ;;  %v201_v38 = vld [vmem:[#allocation8 + $0x38] sm:$0xff]  ;;  %v94_v39 = vperm.slane %v88_v34, 0  ;;  %v100_v40 = vperm.slane %v88_v34, 1 }
  0x1c   :  { %174 = vmatpush.msra.mxu1 %v165_v23  ;;  %214 = vmatpush.msra.mxu2 %v207_v24  ;;  %v202_v36 = vld [vmem:[#allocation8 + $0x40] sm:$0xff]  ;;  %v158_v41 = vld [vmem:[#allocation6 + $0x30] sm:$0xff]  ;;  %v157_v44 = vld [vmem:[#allocation6 + $0x28] sm:$0xff] }
  0x1d   :  { %136 = vmatpush.msra.mxu0 %v119_v9  ;;  %v200_v42 = vld [vmem:[#allocation8 + $0x30] sm:$0xff]  ;;  %v199_v45 = vld [vmem:[#allocation8 + $0x28] sm:$0xff]  ;;  %v331_v47 = vld [vmem:[%s639_s2] ss:$0 sm:$0xff] }
  0x1e   :  { %175 = vmatpush.msra.mxu1 %v164_v25  ;;  %215 = vmatpush.msra.mxu2 %v206_v26  ;;  %v156_v52 = vld [vmem:[#allocation6 + $0x20] sm:$0xff]  ;;  %v155_v54 = vld [vmem:[#allocation6 + $0x18] sm:$0xff]  ;;  %v154_v56 = vld [vmem:[#allocation6 + $0x10] sm:$0xff] }
  0x1f   :  { %137 = vmatpush.msra.mxu0 %v118_v10  ;;  %v198_v53 = vld [vmem:[#allocation8 + $0x20] sm:$0xff]  ;;  %v197_v55 = vld [vmem:[#allocation8 + $0x18] sm:$0xff]  ;;  %v196_v57 = vld [vmem:[#allocation8 + $0x10] sm:$0xff] }
  0x20   :  { %176 = vmatpush.msra.mxu1 %v163_v27  ;;  %216 = vmatpush.msra.mxu2 %v205_v28  ;;  %v153_v58 = vld [vmem:[#allocation6 + $0x8] sm:$0xff]  ;;  %v152_v60 = vld [vmem:[#allocation6] sm:$0xff] }
  0x21   :  { %138 = vmatpush.msra.mxu0 %v117_v11  ;;  %v195_v59 = vld [vmem:[#allocation8 + $0x8] sm:$0xff]  ;;  %v194_v61 = vld [vmem:[#allocation8] sm:$0xff] }
  0x22   :  { %177 = vmatpush.msra.mxu1 %v162_v29  ;;  %217 = vmatpush.msra.mxu2 %v204_v30  ;;  %v332_v62 = vld [vmem:[%s641_s4] ss:$0 sm:$0xff] }
  0x23   :  { %139 = vmatpush.msra.mxu0 %v116_v12  ;;  %v333_v2 = vld [vmem:[%s643_s6] ss:$0 sm:$0xff]  ;;  %s532_s6 = smov [#allocation13]  }
  0x24   :  { %178 = vmatpush.msra.mxu1 %v161_v32  ;;  %218 = vmatpush.msra.mxu2 %v203_v33  ;;  %s290_s8 = sshll.u32 %s532_s6, 4  ;;  %s291_s8 = int_to_ptr.vmem [resolvable:$true] %s290_s8 }
  0x25   :  { %140 = vmatpush.msra.mxu0 %v115_v13 }
  0x26   :  { %179 = vmatpush.msra.mxu1 %v160_v35  ;;  %219 = vmatpush.msra.mxu2 %v202_v36 }
  0x27   :  { %141 = vmatpush.msra.mxu0 %v114_v14 }
  0x28   :  { %180 = vmatpush.msra.mxu1 %v159_v37  ;;  %220 = vmatpush.msra.mxu2 %v201_v38 }
  0x29   :  { %142 = vmatpush.msra.mxu0 %v113_v15 }
  0x2a   :  { %181 = vmatpush.msra.mxu1 %v158_v41  ;;  %221 = vmatpush.msra.mxu2 %v200_v42 }
  0x2b   :  { %143 = vmatpush.msra.mxu0 %v112_v16 }
  0x2c   :  { %182 = vmatpush.msra.mxu1 %v157_v44  ;;  %222 = vmatpush.msra.mxu2 %v199_v45 }
  0x2d   :  { %144 = vmatpush.msra.mxu0 %v111_v17 }
  0x2e   :  { %183 = vmatpush.msra.mxu1 %v156_v52  ;;  %223 = vmatpush.msra.mxu2 %v198_v53 }
  0x2f   :  { %145 = vmatpush.msra.mxu0 %v110_v18 }
  0x30   :  { %184 = vmatpush.msra.mxu1 %v155_v54  ;;  %224 = vmatpush.msra.mxu2 %v197_v55 }
  0x32   :  { %185 = vmatpush.msra.mxu1 %v154_v56  ;;  %225 = vmatpush.msra.mxu2 %v196_v57 }
  0x34   :  { %186 = vmatpush.msra.mxu1 %v153_v58  ;;  %226 = vmatpush.msra.mxu2 %v195_v59 }
  0x36   :  { %187 = vmatpush.msra.mxu1 %v152_v60  ;;  %227 = vmatpush.msra.mxu2 %v194_v61 }
  0x84   :  { %v92_v31 = vpop.permute.xlu0 %91 }
  0x85   :  { %v95_v46 = vmul.f32 %v94_v39, %v92_v31 }
  0x8d   :  { %v98_v43 = vpop.permute.xlu0 %97 }
  0x8e   :  { %v101_v48 = vmul.f32 %v100_v40, %v98_v43 }
  0x90   :  { %v102_v49 = vadd.f32 %v101_v48, %v95_v46 }
  0x92   :  { %v107_v50 = vadd.f32 %v331_v47, %v102_v49 }
  0x94   :  { %334 = vtanh.f32 %v107_v50 }
  0x9a   :  { %v335_v51 = vpop.eup %334 }
  0x9b   :  { %109 = vst [vmem:[#allocation9] sm:$0xff] %v335_v51  ;;  %146 = vmatmul.f32.vlgmr.msra.gmra.mxu0 %v335_v51 }
  0x9c   :  { %262 = dma.vmem_to_hbm [thread:$0]  %s258_s28, 128, %s260_s30, [#allocation5]  }
 0x118   :  { %v147_v63 = vpop.f32.mrf.mxu0 }
 0x119   :  { %v148_v0 = vadd.f32 %v332_v62, %v147_v63 }
 0x11b   :  { %336 = vtanh.f32 %v148_v0 }
 0x121   :  { %v337_v1 = vpop.eup %336 }
 0x122   :  { %151 = vst [vmem:[#allocation10] sm:$0xff] %v337_v1  ;;  %188 = vmatmul.f32.vlgmr.msra.gmra.mxu1 %v337_v1  ;;  %228 = vmatmul.f32.vlgmr.msra.gmra.mxu2 %v337_v1 }
 0x123   :  { %273 = dma.vmem_to_hbm [thread:$0]  %s269_s26, 128, %s271_s24, [#allocation11]  }
 0x19f   :  { %v189_v3 = vpop.f32.mrf.mxu1 }
 0x1a0   :  { %v190_v4 = vadd.f32 %v333_v2, %v189_v3 }
 0x1a2   :  { %338 = vtanh.f32 %v190_v4 }
 0x1a5   :  { %v229_v6 = vpop.f32.mrf.mxu2 }
 0x1a6   :  { %v230_v7 = vadd.f32 %v229_v6, %v211_v5 }
 0x1a8   :  { %v339_v8 = vpop.eup %338  ;;  %v317_v9 = vmul.f32 -1.442695, %v230_v7 }
 0x1a9   :  { %193 = vst [vmem:[#allocation12] sm:$0xff] %v339_v8 }
 0x1aa   :  { %340 = vpow2.f32 %v317_v9  ;;  %284 = dma.vmem_to_hbm [thread:$0]  %s280_s17, 128, %s282_s9, [#allocation11]  }
 0x1b0   :  { %v341_v10 = vpop.eup %340 }
 0x1b1   :  { %v235_v11 = vadd.f32 1.0, %v341_v10 }
 0x1b3   :  { %342 = vrcp.f32 %v235_v11  ;;  %v247_v15 = vand.u32 2147483648, %v235_v11  ;;  %v245_v17 = vand.u32 2147483647, %v235_v11  ;;  %vm241_vm1 = vweird.f32 %v235_v11 }
 0x1b5   :  { %v248_v19 = vor.u32 1.1754944e-38, %v247_v15  ;;  %vm246_vm3 = vcmp.eq.f32.partialorder %v245_v17, 8.507059e+37 }
 0x1b9   :  { %v343_v12 = vpop.eup %342 }
 0x1ba   :  { %v237_v13 = vmul.f32 %v343_v12, %v235_v11  ;;  %vm242_vm0 = vweird.f32 %v343_v12 }
 0x1bb   :  { %vm243_vm2 = vmor %vm241_vm1, %vm242_vm0 }
 0x1bc   :  { %v238_v14 = vsub.f32 1.0, %v237_v13 }
 0x1be   :  { %v239_v16 = vmul.f32 %v343_v12, %v238_v14 }
 0x1c0   :  { %v240_v18 = vadd.f32 %v343_v12, %v239_v16 }
 0x1c2   :  { %v244_v20 = vsel %vm243_vm2, %v343_v12, %v240_v18 }
 0x1c3   :  { %v249_v21 = vsel %vm246_vm3, %v248_v19, %v244_v20 }
 0x1c4   :  { %251 = vst [vmem:[#allocation13] sm:$0xff] %v249_v21 }
 0x1c5   :  { %295 = dma.vmem_to_hbm [thread:$0]  %s291_s8, 128, %s293_s19, [#allocation14]  }
 0x1c6   :  { %516 = dma.done.wait [#allocation5], 128  }
 0x1c7   :  { %517 = vsyncadd [#allocation5], 4294967168 }
 0x1c8   :  { %518 = dma.done.wait [#allocation11], 256  }
 0x1c9   :  { %519 = vsyncadd [#allocation11], 4294967040 }
 0x1ca   :  { %520 = dma.done.wait [#allocation14], 128  }
 0x1cb   :  { %521 = vsyncadd [#allocation14], 4294967168 }
 0x1cc   :  { %312 = vsyncpa [#allocation4], 1 }
 0x1cd   :  { %313 = vsyncpa [#allocation7], 1 }
 0x1ce   :  { %314 = vsyncpa [#allocation5], 1 }
 0x1cf   :  { %315 = vsyncpa [#allocation11], 1 }
 0x1d0   :  { %316 = vsyncpa [#allocation14], 1 }

</bundles_post_ra>
